<compile_context>
chip_gen: v7x
topology: tpu7x:2x2x1
jax: 0.10.0
libtpu: 0.0.40
codegen_flags: <defaults>
</compile_context>

<pallas_src>
import functools

import jax
import jax.numpy as jnp
from jax.experimental import pallas as pl
from jax.experimental.pallas import tpu as pltpu


def _round_up(x, m):
    return (x + m - 1) // m * m


# ---------------------------------------------------------------------------
# Kernel 1: im2col matmul + bias + ReLU + fused 2x2 max-pool (resident weight)
# ---------------------------------------------------------------------------
def _conv_relu_pool_kernel(a_ref, w_ref, b_ref, o_ref):
    """a:(4,TM,Kp) bf16   w:(Kp,TN) bf16 (resident)   b:(1,TN) f32
    o:(TM,TN) bf16.  Grid = (M_tiles, N_tiles); full K reduced in one dot."""
    s4, tm, kp = a_ref.shape
    a = a_ref[...].reshape(s4 * tm, kp)          # merge pool planes into M
    r = jnp.dot(a, w_ref[...], preferred_element_type=jnp.float32)  # (4*TM,TN)
    r = r.reshape(s4, tm, r.shape[-1])
    m = jnp.max(r, axis=0)                        # 2x2 max-pool over the planes
    # maxpool(relu(conv + b)) == relu(max(conv) + b): bias shared, relu monotone
    o_ref[...] = jnp.maximum(m + b_ref[...], 0.0).astype(o_ref.dtype)


def conv2d_relu_maxpool(x_nhwc, w_oikk, b_o, *, k, pad, tn=128):
    """Conv2d(stride=1, padding=pad) + ReLU + MaxPool2d(2,2), fused.

    The kernel stores a lane-dense 128-padded output tile; the wrapper slices
    back to the real Cout so the padding never enters the next contraction.
    Returns (N, H//2, W//2, Cout) bf16."""
    N, H, W, Cin = x_nhwc.shape
    Cout = w_oikk.shape[0]
    assert w_oikk.shape[1] == Cin
    Hp, Wp = H // 2, W // 2
    Kdim = k * k * Cin
    M = N * Hp * Wp

    # im2col already regrouped into the 4 positions of each 2x2 pooling window
    # via strided slices (plane s=(ph,pw) holds conv rows at (2i+ph, 2j+pw)).
    xpad = jnp.pad(x_nhwc, ((0, 0), (pad, pad), (pad, pad), (0, 0)))
    planes = []
    for ph in range(2):
        for pw in range(2):
            taps = [xpad[:, ph + di: ph + di + 2 * Hp: 2,
                            pw + dj: pw + dj + 2 * Wp: 2, :]
                    for di in range(k) for dj in range(k)]
            planes.append(jnp.concatenate(taps, axis=-1).reshape(M, Kdim))
    a = jnp.stack(planes, axis=0)                               # (4, M, Kdim)

    # Tiling: lane-dense output (Np multiple of 128), whole K resident.
    if M >= 128:
        tm = min(128, _round_up((M + 1) // 2, 8))   # >= 2 M tiles -> megacore
    else:
        tm = _round_up(M, 8)
    Mp = _round_up(M, tm)
    Kp = _round_up(Kdim, 128)
    Np = _round_up(Cout, tn)

    a = jnp.pad(a, ((0, 0), (0, Mp - M), (0, Kp - Kdim))).astype(jnp.bfloat16)
    w_mat = jnp.transpose(w_oikk, (2, 3, 1, 0)).reshape(Kdim, Cout)
    w_mat = jnp.pad(w_mat, ((0, Kp - Kdim), (0, Np - Cout))).astype(jnp.bfloat16)
    bias = jnp.pad(b_o, (0, Np - Cout)).reshape(1, Np).astype(jnp.float32)

    grid = (Mp // tm, Np // tn)
    flops = 2 * 4 * M * Kdim * Cout                 # real (un-padded) work
    bytes_accessed = (4 * M * Kdim * 2              # im2col planes (bf16)
                      + Kdim * Cout * 2 + Cout * 4  # weight + bias
                      + M * Cout * 2)               # pooled output (bf16)

    out = pl.pallas_call(
        _conv_relu_pool_kernel,
        out_shape=jax.ShapeDtypeStruct((Mp, Np), jnp.bfloat16),
        grid_spec=pltpu.PrefetchScalarGridSpec(
            num_scalar_prefetch=0,
            grid=grid,
            in_specs=[
                pl.BlockSpec((4, tm, Kp), lambda i, j: (0, i, 0)),
                pl.BlockSpec((Kp, tn), lambda i, j: (0, j)),   # resident weight
                pl.BlockSpec((1, tn), lambda i, j: (0, j)),
            ],
            out_specs=pl.BlockSpec((tm, tn), lambda i, j: (i, j)),
        ),
        compiler_params=pltpu.CompilerParams(
            dimension_semantics=("parallel", "parallel"),
            vmem_limit_bytes=32 * 1024 * 1024),     # tiny tiles; fits v7x's 64 MiB
        cost_estimate=pl.CostEstimate(
            flops=flops, transcendentals=0, bytes_accessed=bytes_accessed),
    )(a, w_mat, bias)

    return out[:M, :Cout].reshape(N, Hp, Wp, Cout)


# ---------------------------------------------------------------------------
# Kernel 2: fused head (conv3 1x1 + ReLU + global-avg-pool + fc1 + ReLU + fc2)
# ---------------------------------------------------------------------------
def _head_kernel(x_ref, w3_ref, b3_ref, w1_ref, b1_ref, w2_ref, b2_ref, o_ref,
                 *, n_img, hw):
    x = x_ref[...]                                                  # (M2, C) bf16
    h3 = jnp.dot(x, w3_ref[...], preferred_element_type=jnp.float32) + b3_ref[...]
    h3 = jnp.maximum(h3, 0.0)                                       # conv3 + ReLU
    pooled = jnp.mean(h3.reshape(n_img, hw, h3.shape[-1]), axis=1)  # avg pool (1,1)
    h1 = jnp.dot(pooled.astype(jnp.bfloat16), w1_ref[...],
                 preferred_element_type=jnp.float32) + b1_ref[...]
    h1 = jnp.maximum(h1, 0.0)                                       # fc1 + ReLU
    out = jnp.dot(h1.astype(jnp.bfloat16), w2_ref[...],
                  preferred_element_type=jnp.float32) + b2_ref[...]  # fc2
    o_ref[...] = out.astype(o_ref.dtype)


def head_conv3_pool_fc(x_nhwc, w3_oikk, b3, w1, b1, w2, b2):
    N, H, W, C = x_nhwc.shape                       # real channels only (64)
    HW = H * W
    M2 = N * HW
    x2 = x_nhwc.reshape(M2, C).astype(jnp.bfloat16)

    C3out, C3in = w3_oikk.shape[0], w3_oikk.shape[1]
    assert C3in == C
    w3p = w3_oikk.reshape(C3out, C3in).T.astype(jnp.bfloat16)       # (C, C3out)
    b3p = b3.reshape(1, C3out).astype(jnp.float32)

    F1in, F1out = w1.shape                                          # (64, 128)
    assert F1in == C3out
    w1p = w1.astype(jnp.bfloat16)
    b1p = b1.reshape(1, F1out).astype(jnp.float32)

    F2in, F2out = w2.shape                                          # (128, classes)
    NCp = _round_up(F2out, 128)                     # lane-dense logits, sliced after
    w2p = jnp.pad(w2, ((0, 0), (0, NCp - F2out))).astype(jnp.bfloat16)
    b2p = jnp.pad(b2, (0, NCp - F2out)).reshape(1, NCp).astype(jnp.float32)

    kernel = functools.partial(_head_kernel, n_img=N, hw=HW)
    out = pl.pallas_call(
        kernel,
        out_shape=jax.ShapeDtypeStruct((N, NCp), jnp.float32),
        grid=(1,),
        in_specs=[
            pl.BlockSpec((M2, C), lambda i: (0, 0)),
            pl.BlockSpec((C, C3out), lambda i: (0, 0)),
            pl.BlockSpec((1, C3out), lambda i: (0, 0)),
            pl.BlockSpec((F1in, F1out), lambda i: (0, 0)),
            pl.BlockSpec((1, F1out), lambda i: (0, 0)),
            pl.BlockSpec((F2in, NCp), lambda i: (0, 0)),
            pl.BlockSpec((1, NCp), lambda i: (0, 0)),
        ],
        out_specs=pl.BlockSpec((N, NCp), lambda i: (0, 0)),
        compiler_params=pltpu.CompilerParams(
            vmem_limit_bytes=32 * 1024 * 1024),
    )(x2, w3p, b3p, w1p, b1p, w2p, b2p)
    return out[:, :F2out]


# ---------------------------------------------------------------------------
# Full forward pass
# ---------------------------------------------------------------------------
def convnet_forward(x_nchw, params):
    x = jnp.transpose(x_nchw, (0, 2, 3, 1)).astype(jnp.bfloat16)    # NCHW -> NHWC
    x = conv2d_relu_maxpool(x, params["conv1_w"], params["conv1_b"], k=5, pad=2)
    x = conv2d_relu_maxpool(x, params["conv2_w"], params["conv2_b"], k=3, pad=1)
    return head_conv3_pool_fc(x, params["conv3_w"], params["conv3_b"],
                              params["fc1_w"], params["fc1_b"],
                              params["fc2_w"], params["fc2_b"])


def init_params(key, input_channels, num_classes):
    ks = jax.random.split(key, 10)
    scale = 0.1
    return {
        "conv1_w": scale * jax.random.normal(ks[0], (32, input_channels, 5, 5), jnp.float32),
        "conv1_b": scale * jax.random.normal(ks[1], (32,), jnp.float32),
        "conv2_w": scale * jax.random.normal(ks[2], (64, 32, 3, 3), jnp.float32),
        "conv2_b": scale * jax.random.normal(ks[3], (64,), jnp.float32),
        "conv3_w": scale * jax.random.normal(ks[4], (64, 64, 1, 1), jnp.float32),
        "conv3_b": scale * jax.random.normal(ks[5], (64,), jnp.float32),
        "fc1_w": scale * jax.random.normal(ks[6], (64, 128), jnp.float32),
        "fc1_b": scale * jax.random.normal(ks[7], (128,), jnp.float32),
        "fc2_w": scale * jax.random.normal(ks[8], (128, num_classes), jnp.float32),
        "fc2_b": scale * jax.random.normal(ks[9], (num_classes,), jnp.float32),
    }


if __name__ == "__main__":
    key = jax.random.PRNGKey(0)
    k_x, k_p = jax.random.split(key)

    N, C_in, H, W = 2, 4, 16, 16
    num_classes = 10

    x = jax.random.normal(k_x, (N, C_in, H, W), jnp.float32)   # NCHW like PyTorch
    params = init_params(k_p, C_in, num_classes)

    out = jax.jit(convnet_forward)(x, params)
    out = jax.block_until_ready(out)
    assert out.shape == (N, num_classes), out.shape
    assert out.dtype == jnp.float32
    print("KERNEL_OK")
</pallas_src>

<mosaic_0001>
module attributes {stable_mosaic.version = 11 : i64} {
  func.func @_conv_relu_pool_kernel(%arg0: i32, %arg1: i32, %arg2: memref<4x64x128xbf16, #tpu.memory_space<vmem>>, %arg3: memref<128x128xbf16, #tpu.memory_space<vmem>>, %arg4: memref<1x128xf32, #tpu.memory_space<vmem>>, %arg5: memref<64x128xbf16, #tpu.memory_space<vmem>>) attributes {dimension_semantics = [#tpu.dimension_semantics<parallel>, #tpu.dimension_semantics<parallel>], iteration_bounds = array<i64: 2, 1>, scalar_prefetch = 0 : i64, scratch_operands = 0 : i64, tpu.core_type = #tpu.core_type<tc>, window_params = [{transform_indices = @transform_0, window_bounds = array<i64: 4, 64, 128>}, {transform_indices = @transform_1, window_bounds = array<i64: 128, 128>}, {transform_indices = @transform_2, window_bounds = array<i64: 1, 128>}, {transform_indices = @transform_3, window_bounds = array<i64: 64, 128>}]} {
    %c0 = arith.constant 0 : index
    %c0_0 = arith.constant 0 : index
    %c0_1 = arith.constant 0 : index
    %0 = vector.load %arg2[%c0, %c0_0, %c0_1] : memref<4x64x128xbf16, #tpu.memory_space<vmem>>, vector<4x64x128xbf16>
    %1 = vector.shape_cast %0 : vector<4x64x128xbf16> to vector<256x128xbf16>
    %c0_2 = arith.constant 0 : index
    %c0_3 = arith.constant 0 : index
    %2 = vector.load %arg3[%c0_2, %c0_3] : memref<128x128xbf16, #tpu.memory_space<vmem>>, vector<128x128xbf16>
    %cst = arith.constant dense<0.000000e+00> : vector<256x128xf32>
    %3 = tpu.matmul %1, %2, %cst {dimension_numbers = #tpu.dot_dimension_numbers<[1], [0], [0], [1], [0, 0, 1, 1], [], []>} : vector<256x128xbf16>, vector<128x128xbf16>, vector<256x128xf32> -> vector<256x128xf32>
    %4 = vector.shape_cast %3 : vector<256x128xf32> to vector<4x64x128xf32>
    %cst_4 = arith.constant dense<0xFF800000> : vector<64x128xf32>
    %5 = vector.multi_reduction <maximumf>, %4, %cst_4 [0] : vector<4x64x128xf32> to vector<64x128xf32>
    %c0_5 = arith.constant 0 : index
    %c0_6 = arith.constant 0 : index
    %6 = vector.load %arg4[%c0_5, %c0_6] : memref<1x128xf32, #tpu.memory_space<vmem>>, vector<1x128xf32>
    %7 = vector.broadcast %6 : vector<1x128xf32> to vector<64x128xf32>
    %8 = arith.addf %5, %7 : vector<64x128xf32>
    %cst_7 = arith.constant 0.000000e+00 : f32
    %9 = vector.broadcast %cst_7 : f32 to vector<64x128xf32>
    %10 = arith.maximumf %8, %9 : vector<64x128xf32>
    %11 = arith.truncf %10 : vector<64x128xf32> to vector<64x128xbf16>
    %c0_8 = arith.constant 0 : index
    %c0_9 = arith.constant 0 : index
    %12 = vector.load %arg5[%c0_8, %c0_9] : memref<64x128xbf16, #tpu.memory_space<vmem>>, vector<64x128xbf16>
    tpu.vector_store %arg5[%c0_8, %c0_9], %11 {strides = array<i32>} : memref<64x128xbf16, #tpu.memory_space<vmem>>, vector<64x128xbf16>,
    return
  }
  func.func @transform_0(%arg0: i32, %arg1: i32) -> (i32, i32, i32) {
    %c0_i32 = arith.constant 0 : i32
    %c0_i32_0 = arith.constant 0 : i32
    %c0_i32_1 = arith.constant 0 : i32
    return %c0_i32, %arg0, %c0_i32_0 : i32, i32, i32
  }
  func.func @transform_1(%arg0: i32, %arg1: i32) -> (i32, i32) {
    %c0_i32 = arith.constant 0 : i32
    %c0_i32_0 = arith.constant 0 : i32
    return %c0_i32, %arg1 : i32, i32
  }
  func.func @transform_2(%arg0: i32, %arg1: i32) -> (i32, i32) {
    %c0_i32 = arith.constant 0 : i32
    %c0_i32_0 = arith.constant 0 : i32
    return %c0_i32, %arg1 : i32, i32
  }
  func.func @transform_3(%arg0: i32, %arg1: i32) -> (i32, i32) {
    %c0_i32 = arith.constant 0 : i32
    return %arg0, %arg1 : i32, i32
  }
}

module attributes {stable_mosaic.version = 11 : i64} {
  func.func @_conv_relu_pool_kernel(%arg0: i32, %arg1: i32, %arg2: memref<4x32x384xbf16, #tpu.memory_space<vmem>>, %arg3: memref<384x128xbf16, #tpu.memory_space<vmem>>, %arg4: memref<1x128xf32, #tpu.memory_space<vmem>>, %arg5: memref<32x128xbf16, #tpu.memory_space<vmem>>) attributes {dimension_semantics = [#tpu.dimension_semantics<parallel>, #tpu.dimension_semantics<parallel>], iteration_bounds = array<i64: 1, 1>, scalar_prefetch = 0 : i64, scratch_operands = 0 : i64, tpu.core_type = #tpu.core_type<tc>, window_params = [{transform_indices = @transform_0, window_bounds = array<i64: 4, 32, 384>}, {transform_indices = @transform_1, window_bounds = array<i64: 384, 128>}, {transform_indices = @transform_2, window_bounds = array<i64: 1, 128>}, {transform_indices = @transform_3, window_bounds = array<i64: 32, 128>}]} {
    %c0 = arith.constant 0 : index
    %c0_0 = arith.constant 0 : index
    %c0_1 = arith.constant 0 : index
    %0 = vector.load %arg2[%c0, %c0_0, %c0_1] : memref<4x32x384xbf16, #tpu.memory_space<vmem>>, vector<4x32x384xbf16>
    %1 = vector.shape_cast %0 : vector<4x32x384xbf16> to vector<128x384xbf16>
    %c0_2 = arith.constant 0 : index
    %c0_3 = arith.constant 0 : index
    %2 = vector.load %arg3[%c0_2, %c0_3] : memref<384x128xbf16, #tpu.memory_space<vmem>>, vector<384x128xbf16>
    %cst = arith.constant dense<0.000000e+00> : vector<128x128xf32>
    %3 = tpu.matmul %1, %2, %cst {dimension_numbers = #tpu.dot_dimension_numbers<[1], [0], [0], [1], [0, 0, 1, 1], [], []>} : vector<128x384xbf16>, vector<384x128xbf16>, vector<128x128xf32> -> vector<128x128xf32>
    %4 = vector.shape_cast %3 : vector<128x128xf32> to vector<4x32x128xf32>
    %cst_4 = arith.constant dense<0xFF800000> : vector<32x128xf32>
    %5 = vector.multi_reduction <maximumf>, %4, %cst_4 [0] : vector<4x32x128xf32> to vector<32x128xf32>
    %c0_5 = arith.constant 0 : index
    %c0_6 = arith.constant 0 : index
    %6 = vector.load %arg4[%c0_5, %c0_6] : memref<1x128xf32, #tpu.memory_space<vmem>>, vector<1x128xf32>
    %7 = vector.broadcast %6 : vector<1x128xf32> to vector<32x128xf32>
    %8 = arith.addf %5, %7 : vector<32x128xf32>
    %cst_7 = arith.constant 0.000000e+00 : f32
    %9 = vector.broadcast %cst_7 : f32 to vector<32x128xf32>
    %10 = arith.maximumf %8, %9 : vector<32x128xf32>
    %11 = arith.truncf %10 : vector<32x128xf32> to vector<32x128xbf16>
    %c0_8 = arith.constant 0 : index
    %c0_9 = arith.constant 0 : index
    %12 = vector.load %arg5[%c0_8, %c0_9] : memref<32x128xbf16, #tpu.memory_space<vmem>>, vector<32x128xbf16>
    tpu.vector_store %arg5[%c0_8, %c0_9], %11 {strides = array<i32>} : memref<32x128xbf16, #tpu.memory_space<vmem>>, vector<32x128xbf16>,
    return
  }
  func.func @transform_0(%arg0: i32, %arg1: i32) -> (i32, i32, i32) {
    %c0_i32 = arith.constant 0 : i32
    %c0_i32_0 = arith.constant 0 : i32
    %c0_i32_1 = arith.constant 0 : i32
    return %c0_i32, %arg0, %c0_i32_0 : i32, i32, i32
  }
  func.func @transform_1(%arg0: i32, %arg1: i32) -> (i32, i32) {
    %c0_i32 = arith.constant 0 : i32
    %c0_i32_0 = arith.constant 0 : i32
    return %c0_i32, %arg1 : i32, i32
  }
  func.func @transform_2(%arg0: i32, %arg1: i32) -> (i32, i32) {
    %c0_i32 = arith.constant 0 : i32
    %c0_i32_0 = arith.constant 0 : i32
    return %c0_i32, %arg1 : i32, i32
  }
  func.func @transform_3(%arg0: i32, %arg1: i32) -> (i32, i32) {
    %c0_i32 = arith.constant 0 : i32
    return %arg0, %arg1 : i32, i32
  }
}

module attributes {stable_mosaic.version = 11 : i64} {
  func.func @_head_kernel(%arg0: i32, %arg1: memref<32x64xbf16, #tpu.memory_space<vmem>>, %arg2: memref<64x64xbf16, #tpu.memory_space<vmem>>, %arg3: memref<1x64xf32, #tpu.memory_space<vmem>>, %arg4: memref<64x128xbf16, #tpu.memory_space<vmem>>, %arg5: memref<1x128xf32, #tpu.memory_space<vmem>>, %arg6: memref<128x128xbf16, #tpu.memory_space<vmem>>, %arg7: memref<1x128xf32, #tpu.memory_space<vmem>>, %arg8: memref<2x128xf32, #tpu.memory_space<vmem>>) attributes {dimension_semantics = [#tpu.dimension_semantics<arbitrary>], iteration_bounds = array<i64: 1>, scalar_prefetch = 0 : i64, scratch_operands = 0 : i64, tpu.core_type = #tpu.core_type<tc>, window_params = [{pipeline_mode = #tpu.pipeline_mode<synchronous>, transform_indices = @transform_0, window_bounds = array<i64: 32, 64>}, {pipeline_mode = #tpu.pipeline_mode<synchronous>, transform_indices = @transform_1, window_bounds = array<i64: 64, 64>}, {pipeline_mode = #tpu.pipeline_mode<synchronous>, transform_indices = @transform_2, window_bounds = array<i64: 1, 64>}, {pipeline_mode = #tpu.pipeline_mode<synchronous>, transform_indices = @transform_3, window_bounds = array<i64: 64, 128>}, {pipeline_mode = #tpu.pipeline_mode<synchronous>, transform_indices = @transform_4, window_bounds = array<i64: 1, 128>}, {pipeline_mode = #tpu.pipeline_mode<synchronous>, transform_indices = @transform_5, window_bounds = array<i64: 128, 128>}, {pipeline_mode = #tpu.pipeline_mode<synchronous>, transform_indices = @transform_6, window_bounds = array<i64: 1, 128>}, {pipeline_mode = #tpu.pipeline_mode<synchronous>, transform_indices = @transform_7, window_bounds = array<i64: 2, 128>}]} {
    %c0 = arith.constant 0 : index
    %c0_0 = arith.constant 0 : index
    %0 = vector.load %arg1[%c0, %c0_0] : memref<32x64xbf16, #tpu.memory_space<vmem>>, vector<32x64xbf16>
    %c0_1 = arith.constant 0 : index
    %c0_2 = arith.constant 0 : index
    %1 = vector.load %arg2[%c0_1, %c0_2] : memref<64x64xbf16, #tpu.memory_space<vmem>>, vector<64x64xbf16>
    %cst = arith.constant dense<0.000000e+00> : vector<32x64xf32>
    %2 = tpu.matmul %0, %1, %cst {dimension_numbers = #tpu.dot_dimension_numbers<[1], [0], [0], [1], [0, 0, 1, 1], [], []>} : vector<32x64xbf16>, vector<64x64xbf16>, vector<32x64xf32> -> vector<32x64xf32>
    %c0_3 = arith.constant 0 : index
    %c0_4 = arith.constant 0 : index
    %3 = vector.load %arg3[%c0_3, %c0_4] : memref<1x64xf32, #tpu.memory_space<vmem>>, vector<1x64xf32>
    %4 = vector.broadcast %3 : vector<1x64xf32> to vector<32x64xf32>
    %5 = arith.addf %2, %4 : vector<32x64xf32>
    %cst_5 = arith.constant 0.000000e+00 : f32
    %6 = vector.broadcast %cst_5 : f32 to vector<32x64xf32>
    %7 = arith.maximumf %5, %6 : vector<32x64xf32>
    %8 = vector.shape_cast %7 : vector<32x64xf32> to vector<2x16x64xf32>
    %cst_6 = arith.constant dense<0.000000e+00> : vector<2x64xf32>
    %9 = vector.multi_reduction <add>, %8, %cst_6 [1] : vector<2x16x64xf32> to vector<2x64xf32>
    %cst_7 = arith.constant 1.600000e+01 : f32
    %10 = vector.broadcast %cst_7 : f32 to vector<2x64xf32>
    %11 = arith.divf %9, %10 : vector<2x64xf32>
    %12 = arith.truncf %11 : vector<2x64xf32> to vector<2x64xbf16>
    %c0_8 = arith.constant 0 : index
    %c0_9 = arith.constant 0 : index
    %13 = vector.load %arg4[%c0_8, %c0_9] : memref<64x128xbf16, #tpu.memory_space<vmem>>, vector<64x128xbf16>
    %cst_10 = arith.constant dense<0.000000e+00> : vector<2x128xf32>
    %14 = tpu.matmul %12, %13, %cst_10 {dimension_numbers = #tpu.dot_dimension_numbers<[1], [0], [0], [1], [0, 0, 1, 1], [], []>} : vector<2x64xbf16>, vector<64x128xbf16>, vector<2x128xf32> -> vector<2x128xf32>
    %c0_11 = arith.constant 0 : index
    %c0_12 = arith.constant 0 : index
    %15 = vector.load %arg5[%c0_11, %c0_12] : memref<1x128xf32, #tpu.memory_space<vmem>>, vector<1x128xf32>
    %16 = vector.broadcast %15 : vector<1x128xf32> to vector<2x128xf32>
    %17 = arith.addf %14, %16 : vector<2x128xf32>
    %cst_13 = arith.constant 0.000000e+00 : f32
    %18 = vector.broadcast %cst_13 : f32 to vector<2x128xf32>
    %19 = arith.maximumf %17, %18 : vector<2x128xf32>
    %20 = arith.truncf %19 : vector<2x128xf32> to vector<2x128xbf16>
    %c0_14 = arith.constant 0 : index
    %c0_15 = arith.constant 0 : index
    %21 = vector.load %arg6[%c0_14, %c0_15] : memref<128x128xbf16, #tpu.memory_space<vmem>>, vector<128x128xbf16>
    %cst_16 = arith.constant dense<0.000000e+00> : vector<2x128xf32>
    %22 = tpu.matmul %20, %21, %cst_16 {dimension_numbers = #tpu.dot_dimension_numbers<[1], [0], [0], [1], [0, 0, 1, 1], [], []>} : vector<2x128xbf16>, vector<128x128xbf16>, vector<2x128xf32> -> vector<2x128xf32>
    %c0_17 = arith.constant 0 : index
    %c0_18 = arith.constant 0 : index
    %23 = vector.load %arg7[%c0_17, %c0_18] : memref<1x128xf32, #tpu.memory_space<vmem>>, vector<1x128xf32>
    %24 = vector.broadcast %23 : vector<1x128xf32> to vector<2x128xf32>
    %25 = arith.addf %22, %24 : vector<2x128xf32>
    %c0_19 = arith.constant 0 : index
    %c0_20 = arith.constant 0 : index
    %26 = vector.load %arg8[%c0_19, %c0_20] : memref<2x128xf32, #tpu.memory_space<vmem>>, vector<2x128xf32>
    tpu.vector_store %arg8[%c0_19, %c0_20], %25 {strides = array<i32>} : memref<2x128xf32, #tpu.memory_space<vmem>>, vector<2x128xf32>,
    return
  }
  func.func @transform_0(%arg0: i32) -> (i32, i32) {
    %c0_i32 = arith.constant 0 : i32
    %c0_i32_0 = arith.constant 0 : i32
    %c0_i32_1 = arith.constant 0 : i32
    return %c0_i32, %c0_i32_0 : i32, i32
  }
  func.func @transform_1(%arg0: i32) -> (i32, i32) {
    %c0_i32 = arith.constant 0 : i32
    %c0_i32_0 = arith.constant 0 : i32
    %c0_i32_1 = arith.constant 0 : i32
    return %c0_i32, %c0_i32_0 : i32, i32
  }
  func.func @transform_2(%arg0: i32) -> (i32, i32) {
    %c0_i32 = arith.constant 0 : i32
    %c0_i32_0 = arith.constant 0 : i32
    %c0_i32_1 = arith.constant 0 : i32
    return %c0_i32, %c0_i32_0 : i32, i32
  }
  func.func @transform_3(%arg0: i32) -> (i32, i32) {
    %c0_i32 = arith.constant 0 : i32
    %c0_i32_0 = arith.constant 0 : i32
    %c0_i32_1 = arith.constant 0 : i32
    return %c0_i32, %c0_i32_0 : i32, i32
  }
  func.func @transform_4(%arg0: i32) -> (i32, i32) {
    %c0_i32 = arith.constant 0 : i32
    %c0_i32_0 = arith.constant 0 : i32
    %c0_i32_1 = arith.constant 0 : i32
    return %c0_i32, %c0_i32_0 : i32, i32
  }
  func.func @transform_5(%arg0: i32) -> (i32, i32) {
    %c0_i32 = arith.constant 0 : i32
    %c0_i32_0 = arith.constant 0 : i32
    %c0_i32_1 = arith.constant 0 : i32
    return %c0_i32, %c0_i32_0 : i32, i32
  }
  func.func @transform_6(%arg0: i32) -> (i32, i32) {
    %c0_i32 = arith.constant 0 : i32
    %c0_i32_0 = arith.constant 0 : i32
    %c0_i32_1 = arith.constant 0 : i32
    return %c0_i32, %c0_i32_0 : i32, i32
  }
  func.func @transform_7(%arg0: i32) -> (i32, i32) {
    %c0_i32 = arith.constant 0 : i32
    %c0_i32_0 = arith.constant 0 : i32
    %c0_i32_1 = arith.constant 0 : i32
    return %c0_i32, %c0_i32_0 : i32, i32
  }
}

</mosaic_0001>

<bundles_post_ra>
// kernel: convnet_forward.3
= control target key start
LH: loop header
LB: loop body
LE: loop exit
PB: predicated region body
PF: predicated region fallthrough
CT: control target
= control target key end

     0   :  { %s1231_s12 = smov 0   ;;  %s1233_s13 = smov 0   ;;  %s1359_s0 = inlined_call_operand.vmem [shape: bf16[4,128,128], index: 0, kind: input, shape index: {}]   ;;  %s1360_s1 = inlined_call_operand.vmem [shape: bf16[128,128], index: 1, kind: input, shape index: {}]   ;;  %s1361_s2 = inlined_call_operand.vmem [shape: f32[1,128], index: 2, kind: input, shape index: {}]   ;;  %s1362_s3 = inlined_call_operand.vmem [shape: bf16[128,128], index: 3, kind: output, shape index: {}]  }
   0x1   :  { %s1235_s14 = smov 0   ;;  %s1237_s15 = smov 0  }
   0x2   :  { %s1239_s16 = smov 0  }
   0x3 LB: > { %s25_s17 = sadd.s32 1, %s1205_s15  ;;  %p39_p1 = scmp.ne.s32.totalorder %s1197_s13, %s1193_s12  ;;  %s1209_s16 = sphi %s1239_s16, %s13_s16   ;;  %s1205_s15 = sphi %s1237_s15, %s1366_s15   ;;  %s1201_s14 = sphi %s1235_s14, %s1365_s14   ;;  %s1197_s13 = sphi %s1233_s13, %s1364_s13   ;;  %s1193_s12 = sphi %s1231_s12, %s1363_s12  }
   0x4   : > { %p27_p0 = scmp.ge.s32.totalorder %s25_s17, 2  ;;  %p40_p2 = scmp.eq.s32.totalorder %s1209_s16, 0 }
   0x5   : > { %s32_s19 = sadd.s32 1, %s1197_s13  ;;  %p944_p5 = scmp.ge.s32.totalorder %s1209_s16, 2 }
   0x6   : > { %s1368_s17 = smov (%p27_p0, %s25_s17), 0  ;;  %p41_p3 = por %p40_p2, %p39_p1 }
   0x7   : > { %s29_s18 = ssub.s32 %s1205_s15, %s1368_s17  ;;  %158 = sbr.rel (%p944_p5) target bundleno = 26 (0x1a), region = 24 }
   0x8   : > { %p30_p4 = scmp.eq.s32.totalorder %s29_s18, 0 }
   0xa   : > { %s1266_s20 = scalar_select %p30_p4, %s1197_s13, %s32_s19  }
   0xe   : > { %161 = sbr.rel (!%p41_p3) target bundleno = 26 (0x1a), region = 28  ;;  %s163_s21 = sand.u32 (%p41_p3), 1, %s1197_s13  }
   0xf   : > { %s987_s22 = sshll.u32 (%p41_p3), %s1205_s15, 5  ;;  %s945_s23 = sshll.u32 (%p41_p3), %s163_s21, 7 }
  0x10   : > { %s1274_s26 = scalar_lea.vmem (%p41_p3), %s1359_s0, %s987_s22  ;;  %s165_s27 = scalar_lea.vmem (%p41_p3), [#allocation2], %s945_s23 }
  0x11   : > { %v184_v0 = vld [vmem:[%s1274_s26] sm:$0xff] (%p41_p3)   ;;  %v188_v1 = vld [vmem:[%s1274_s26 + $0x8] sm:$0xff] (%p41_p3)   ;;  %v192_v2 = vld [vmem:[%s1274_s26 + $0x10] sm:$0xff] (%p41_p3)  }
  0x12   : > { %185 = vst [vmem:[%s165_s27] sm:$0xff] (%p41_p3), %v184_v0   ;;  %189 = vst [vmem:[%s165_s27 + $0x8] sm:$0xff] (%p41_p3), %v188_v1   ;;  %v196_v3 = vld [vmem:[%s1274_s26 + $0x18] sm:$0xff] (%p41_p3)   ;;  %v200_v4 = vld [vmem:[%s1274_s26 + $0x40] sm:$0xff] (%p41_p3)  }
  0x13   : > { %193 = vst [vmem:[%s165_s27 + $0x10] sm:$0xff] (%p41_p3), %v192_v2   ;;  %v204_v5 = vld [vmem:[%s1274_s26 + $0x48] sm:$0xff] (%p41_p3)   ;;  %197 = vst [vmem:[%s165_s27 + $0x18] sm:$0xff] (%p41_p3), %v196_v3   ;;  %v208_v6 = vld [vmem:[%s1274_s26 + $0x50] sm:$0xff] (%p41_p3)  }
  0x14   : > { %201 = vst [vmem:[%s165_s27 + $0x20] sm:$0xff] (%p41_p3), %v200_v4   ;;  %205 = vst [vmem:[%s165_s27 + $0x28] sm:$0xff] (%p41_p3), %v204_v5   ;;  %v212_v7 = vld [vmem:[%s1274_s26 + $0x58] sm:$0xff] (%p41_p3)   ;;  %v216_v8 = vld [vmem:[%s1274_s26 + $0x80] sm:$0xff] (%p41_p3)  }
  0x15   : > { %209 = vst [vmem:[%s165_s27 + $0x30] sm:$0xff] %v208_v6   ;;  %213 = vst [vmem:[%s165_s27 + $0x38] sm:$0xff] %v212_v7   ;;  %v220_v9 = vld [vmem:[%s1274_s26 + $0x88] sm:$0xff]   ;;  %v224_v10 = vld [vmem:[%s1274_s26 + $0x90] sm:$0xff]  }
  0x16   : > { %217 = vst [vmem:[%s165_s27 + $0x40] sm:$0xff] %v216_v8   ;;  %v228_v11 = vld [vmem:[%s1274_s26 + $0x98] sm:$0xff]   ;;  %221 = vst [vmem:[%s165_s27 + $0x48] sm:$0xff] %v220_v9   ;;  %v232_v12 = vld [vmem:[%s1274_s26 + $0xc0] sm:$0xff]  }
  0x17   : > { %225 = vst [vmem:[%s165_s27 + $0x50] sm:$0xff] %v224_v10   ;;  %229 = vst [vmem:[%s165_s27 + $0x58] sm:$0xff] %v228_v11   ;;  %v236_v13 = vld [vmem:[%s1274_s26 + $0xc8] sm:$0xff]   ;;  %v240_v14 = vld [vmem:[%s1274_s26 + $0xd0] sm:$0xff]  }
  0x18   : > { %233 = vst [vmem:[%s165_s27 + $0x60] sm:$0xff] %v232_v12   ;;  %237 = vst [vmem:[%s165_s27 + $0x68] sm:$0xff] %v236_v13   ;;  %v244_v15 = vld [vmem:[%s1274_s26 + $0xd8] sm:$0xff]  }
  0x19   : > { %241 = vst [vmem:[%s165_s27 + $0x70] sm:$0xff] %v240_v14   ;;  %245 = vst [vmem:[%s165_s27 + $0x78] sm:$0xff] %v244_v15  }
  0x1a PF: > { %p948_p6 = scmp.ge.s32.totalorder %s1209_s16, 1  ;;  %p333_p7 = scmp.lt.s32.totalorder %s1209_s16, 3 }
  0x1c   : > { %p334_p8 = pnand %p948_p6, %p333_p7 }
  0x1d   : > { %v1147_v16 = vld [vmem:[%s1360_s1] sm:$0xff] (!%p334_p8)   ;;  %s340_s30 = sand.u32 (!%p334_p8), 1, %s1193_s12   ;;  %v1148_v17 = vld [vmem:[%s1360_s1 + $0x8] sm:$0xff] (!%p334_p8)   ;;  %v1149_v18 = vld [vmem:[%s1360_s1 + $0x10] sm:$0xff] (!%p334_p8)   ;;  %s950_s26 = sshll.u32 (!%p334_p8), %s1201_s14, 3 }
  0x1e   : > { %337 = sbr.rel (%p334_p8) target bundleno = 314 (0x13a), region = 69  ;;  %1043 = vmatprep.subr.bf16.mxu0 (!%p334_p8), %v1147_v16  ;;  %1091 = vmatprep.subr.bf16.mxu1 (!%p334_p8), %v1147_v16  ;;  %s949_s6 = sshll.u32 (!%p334_p8), %s340_s30, 7  ;;  %v1150_v19 = vld [vmem:[%s1360_s1 + $0x18] sm:$0xff] (!%p334_p8)   ;;  %v1151_v22 = vld [vmem:[%s1360_s1 + $0x20] sm:$0xff] (!%p334_p8)   ;;  %v1152_v23 = vld [vmem:[%s1360_s1 + $0x28] sm:$0xff] (!%p334_p8)  }
  0x1f   : > { %1044 = vmatpush3.bf16.msra.mxu0 (!%p334_p8), %v1147_v16  ;;  %1099 = vmatpush3.bf16.msra.mxu1 (!%p334_p8), %v1147_v16  ;;  %s1307_s11 = scalar_lea.vmem (!%p334_p8), [#allocation2], %s949_s6  ;;  %v1153_v24 = vld [vmem:[%s1360_s1 + $0x30] sm:$0xff] (!%p334_p8)   ;;  %v1154_v25 = vld [vmem:[%s1360_s1 + $0x38] sm:$0xff] (!%p334_p8)   ;;  %p382_p9 = scmp.lt.s32.totalorder (!%p334_p8), %s950_s26, 15  ;;  %v976_v4 = vld [vmem:[%s1361_s2] ss:$0 sm:$0xff] (!%p334_p8) }
  0x20   : > { %1045 = vmatprep.subr.bf16.mxu0 (!%p334_p8), %v1148_v17  ;;  %1092 = vmatprep.subr.bf16.mxu1 (!%p334_p8), %v1148_v17  ;;  %v1155_v20 = vld [vmem:[%s1307_s11] sm:$0xff] (!%p334_p8)   ;;  %v1156_v26 = vld [vmem:[%s1307_s11 + $0x8] sm:$0xff] (!%p334_p8)   ;;  %v1159_v28 = vld [vmem:[%s1307_s11 + $0x10] sm:$0xff] (!%p334_p8)  }
  0x21   : > { %1059 = vmatprep.mubr.bf16.mxu0 (!%p334_p8), %v1155_v20  ;;  %v1157_v21 = vld [vmem:[%s1307_s11 + $0x40] sm:$0xff] (!%p334_p8)   ;;  %v1158_v27 = vld [vmem:[%s1307_s11 + $0x48] sm:$0xff] (!%p334_p8)   ;;  %v1161_v29 = vld [vmem:[%s1307_s11 + $0x50] sm:$0xff] (!%p334_p8)  }
  0x22   : > { %1075 = vmatprep.mubr.bf16.mxu1 (!%p334_p8), %v1157_v21  ;;  %v1160_v30 = vld [vmem:[%s1307_s11 + $0x18] sm:$0xff] (!%p334_p8)   ;;  %v1163_v32 = vld [vmem:[%s1307_s11 + $0x20] sm:$0xff] (!%p334_p8)   ;;  %v1164_v34 = vld [vmem:[%s1307_s11 + $0x28] sm:$0xff] (!%p334_p8)  }
  0x23   : > { %1046 = vmatpush3.bf16.msra.mxu0 (!%p334_p8), %v1148_v17  ;;  %1100 = vmatpush3.bf16.msra.mxu1 (!%p334_p8), %v1148_v17  ;;  %v1162_v31 = vld [vmem:[%s1307_s11 + $0x58] sm:$0xff] (!%p334_p8)   ;;  %v1165_v33 = vld [vmem:[%s1307_s11 + $0x60] sm:$0xff] (!%p334_p8)   ;;  %v1166_v35 = vld [vmem:[%s1307_s11 + $0x68] sm:$0xff] (!%p334_p8)  }
  0x24   : > { %1047 = vmatprep.subr.bf16.mxu0 (!%p334_p8), %v1149_v18  ;;  %1093 = vmatprep.subr.bf16.mxu1 (!%p334_p8), %v1149_v18  ;;  %v1167_v36 = vld [vmem:[%s1307_s11 + $0x30] sm:$0xff] (!%p334_p8)   ;;  %v1168_v38 = vld [vmem:[%s1307_s11 + $0x38] sm:$0xff] (!%p334_p8)  }
  0x25   : > { %v1169_v37 = vld [vmem:[%s1307_s11 + $0x70] sm:$0xff]   ;;  %v1170_v39 = vld [vmem:[%s1307_s11 + $0x78] sm:$0xff]   ;;  %s1370_s26 = smov (!%p382_p9, %s950_s26), 15 }
  0x26   : > { %s951_s14 = sshll.u32 %s1370_s26, 2 }
  0x27   : > { %1048 = vmatpush3.bf16.msra.mxu0 %v1149_v18  ;;  %1101 = vmatpush3.bf16.msra.mxu1 %v1149_v18  ;;  %s388_s4 = scalar_lea.vmem %s1362_s3, %s951_s14 }
  0x28   : > { %1049 = vmatprep.subr.bf16.mxu0 %v1150_v19  ;;  %1094 = vmatprep.subr.bf16.mxu1 %v1150_v19 }
  0x2b   : > { %1050 = vmatpush3.bf16.msra.mxu0 %v1150_v19  ;;  %1102 = vmatpush3.bf16.msra.mxu1 %v1150_v19 }
  0x2c   : > { %1051 = vmatprep.subr.bf16.mxu0 %v1151_v22  ;;  %1095 = vmatprep.subr.bf16.mxu1 %v1151_v22 }
  0x2f   : > { %1052 = vmatpush3.bf16.msra.mxu0 %v1151_v22  ;;  %1103 = vmatpush3.bf16.msra.mxu1 %v1151_v22 }
  0x30   : > { %1053 = vmatprep.subr.bf16.mxu0 %v1152_v23  ;;  %1096 = vmatprep.subr.bf16.mxu1 %v1152_v23 }
  0x33   : > { %1054 = vmatpush3.bf16.msra.mxu0 %v1152_v23  ;;  %1104 = vmatpush3.bf16.msra.mxu1 %v1152_v23 }
  0x34   : > { %1055 = vmatprep.subr.bf16.mxu0 %v1153_v24  ;;  %1097 = vmatprep.subr.bf16.mxu1 %v1153_v24 }
  0x37   : > { %1056 = vmatpush3.bf16.msra.mxu0 %v1153_v24  ;;  %1105 = vmatpush3.bf16.msra.mxu1 %v1153_v24 }
  0x38   : > { %1057 = vmatprep.subr.bf16.mxu0 %v1154_v25  ;;  %1098 = vmatprep.subr.bf16.mxu1 %v1154_v25 }
  0x3b   : > { %1058 = vmatpush3.bf16.msra.mxu0 %v1154_v25  ;;  %1106 = vmatpush3.bf16.msra.mxu1 %v1154_v25 }
  0x3e   : > { %1060 = vmatmul.mubr.bf16.vlgmr.msra.gmra.mrb[0].mxu0 %v1156_v26  ;;  %1076 = vmatmul.mubr.bf16.vlgmr.msra.gmra.mrb[0].mxu1 %v1158_v27 }
  0x3f   : > { %1063 = vmatprep.mubr.bf16.mxu0 %v1159_v28  ;;  %1079 = vmatprep.mubr.bf16.mxu1 %v1161_v29 }
  0x46   : > { %1064 = vmatmul.mubr.bf16.gmra.mrb[4].mxu0 %v1160_v30  ;;  %1080 = vmatmul.mubr.bf16.gmra.mrb[4].mxu1 %v1162_v31 }
  0x47   : > { %1067 = vmatprep.mubr.bf16.mxu0 %v1163_v32  ;;  %1083 = vmatprep.mubr.bf16.mxu1 %v1165_v33 }
  0x4e   : > { %1068 = vmatmul.mubr.bf16.gmra.mrb[8].mxu0 %v1164_v34  ;;  %1084 = vmatmul.mubr.bf16.gmra.mrb[8].mxu1 %v1166_v35 }
  0x4f   : > { %1071 = vmatprep.mubr.bf16.mxu0 %v1167_v36  ;;  %1087 = vmatprep.mubr.bf16.mxu1 %v1169_v37 }
  0x56   : > { %1072 = vmatmul.mubr.bf16.gmra.mrb[12].mxu0 %v1168_v38  ;;  %1088 = vmatmul.mubr.bf16.gmra.mrb[12].mxu1 %v1170_v39 }
 0x111   : > { %v1061_v40 = vpop.f32.mrb[0].mxu0  ;;  %v1077_v41 = vpop.f32.mrb[0].mxu1 }
 0x112   : > { %v617_v42 = vpop.f32.mrb[1].mxu0  ;;  %v681_v43 = vpop.f32.mrb[1].mxu1 }
 0x113   : > { %v1062_v44 = vpop.f32.mrb[2].mxu0  ;;  %v1078_v45 = vpop.f32.mrb[2].mxu1 }
 0x114   : > { %v620_v46 = vpop.f32.mrb[3].mxu0  ;;  %v684_v47 = vpop.f32.mrb[3].mxu1 }
 0x119   : > { %v1065_v48 = vpop.f32.mrb[4].mxu0  ;;  %v1081_v49 = vpop.f32.mrb[4].mxu1 }
 0x11a   : > { %v633_v50 = vpop.f32.mrb[5].mxu0  ;;  %v697_v51 = vpop.f32.mrb[5].mxu1 }
 0x11b   : > { %v1066_v52 = vpop.f32.mrb[6].mxu0  ;;  %v1082_v53 = vpop.f32.mrb[6].mxu1 }
 0x11c   : > { %v636_v54 = vpop.f32.mrb[7].mxu0  ;;  %v700_v55 = vpop.f32.mrb[7].mxu1 }
 0x121   : > { %v1069_v56 = vpop.f32.mrb[8].mxu0  ;;  %v1085_v57 = vpop.f32.mrb[8].mxu1 }
 0x122   : > { %v750_v58 = vmax.f32 %v1061_v40, %v1069_v56  ;;  %v649_v59 = vpop.f32.mrb[9].mxu0  ;;  %v713_v60 = vpop.f32.mrb[9].mxu1 }
 0x123   : > { %v744_v61 = vmax.f32 %v617_v42, %v649_v59  ;;  %v1070_v62 = vpop.f32.mrb[10].mxu0  ;;  %v1086_v63 = vpop.f32.mrb[10].mxu1 }
 0x124   : > { %v751_v0 = vmax.f32 %v750_v58, %v1077_v41  ;;  %v753_v1 = vmax.f32 %v1062_v44, %v1070_v62  ;;  %v652_v2 = vpop.f32.mrb[11].mxu0  ;;  %v716_v3 = vpop.f32.mrb[11].mxu1 }
 0x125   : > { %v745_v5 = vmax.f32 %v744_v61, %v681_v43  ;;  %v747_v6 = vmax.f32 %v620_v46, %v652_v2 }
 0x126   : > { %v752_v7 = vmax.f32 %v751_v0, %v1085_v57  ;;  %v754_v8 = vmax.f32 %v753_v1, %v1078_v45 }
 0x127   : > { %v746_v9 = vmax.f32 %v745_v5, %v713_v60  ;;  %v748_v10 = vmax.f32 %v747_v6, %v684_v47 }
 0x128   : > { %v777_v11 = vadd.f32 %v976_v4, %v752_v7  ;;  %v755_v12 = vmax.f32 %v754_v8, %v1086_v63 }
 0x129   : > { %v775_v13 = vadd.f32 %v976_v4, %v746_v9  ;;  %v749_v14 = vmax.f32 %v748_v10, %v716_v3  ;;  %v1073_v15 = vpop.f32.mrb[12].mxu0  ;;  %v1089_v16 = vpop.f32.mrb[12].mxu1 }
 0x12a   : > { %v778_v17 = vadd.f32 %v976_v4, %v755_v12  ;;  %v762_v18 = vmax.f32 %v1065_v48, %v1073_v15  ;;  %v665_v19 = vpop.f32.mrb[13].mxu0  ;;  %v729_v20 = vpop.f32.mrb[13].mxu1  ;;  %v785_v25 = vmax.f32 %v777_v11, 0.0 }
 0x12b   : > { %v776_v21 = vadd.f32 %v976_v4, %v749_v14  ;;  %v756_v22 = vmax.f32 %v633_v50, %v665_v19  ;;  %v1074_v23 = vpop.f32.mrb[14].mxu0  ;;  %v1090_v24 = vpop.f32.mrb[14].mxu1  ;;  %v783_v31 = vmax.f32 %v775_v13, 0.0 }
 0x12c   : > { %v786_v26 = vmax.f32 %v778_v17, 0.0  ;;  %v763_v27 = vmax.f32 %v762_v18, %v1081_v49  ;;  %v765_v28 = vmax.f32 %v1066_v52, %v1074_v23  ;;  %v668_v29 = vpop.f32.mrb[15].mxu0  ;;  %v732_v30 = vpop.f32.mrb[15].mxu1 }
 0x12d   : > { %v784_v32 = vmax.f32 %v776_v21, 0.0  ;;  %v757_v33 = vmax.f32 %v756_v22, %v697_v51  ;;  %v759_v34 = vmax.f32 %v636_v54, %v668_v29 }
 0x12e   : > { %v1004_v35 = vpack.c.bf16 %v786_v26, %v785_v25  ;;  %v764_v36 = vmax.f32 %v763_v27, %v1089_v16  ;;  %v766_v37 = vmax.f32 %v765_v28, %v1082_v53 }
 0x12f   : > { %v999_v38 = vpack.c.bf16 %v784_v32, %v783_v31  ;;  %v758_v39 = vmax.f32 %v757_v33, %v729_v20  ;;  %v760_v40 = vmax.f32 %v759_v34, %v700_v55 }
 0x130   : > { %1016 = vst [vmem:[%s388_s4 + $0x8] sm:$0xff] %v1004_v35   ;;  %v781_v41 = vadd.f32 %v976_v4, %v764_v36  ;;  %v767_v42 = vmax.f32 %v766_v37, %v1090_v24 }
 0x131   : > { %1000 = vst [vmem:[%s388_s4] sm:$0xff] %v999_v38   ;;  %v779_v43 = vadd.f32 %v976_v4, %v758_v39  ;;  %v761_v44 = vmax.f32 %v760_v40, %v732_v30 }
 0x132   : > { %v782_v45 = vadd.f32 %v976_v4, %v767_v42  ;;  %v789_v47 = vmax.f32 %v781_v41, 0.0 }
 0x133   : > { %v780_v46 = vadd.f32 %v976_v4, %v761_v44  ;;  %v787_v49 = vmax.f32 %v779_v43, 0.0 }
 0x134   : > { %v790_v48 = vmax.f32 %v782_v45, 0.0 }
 0x135   : > { %v788_v50 = vmax.f32 %v780_v46, 0.0 }
 0x136   : > { %v1014_v51 = vpack.c.bf16 %v790_v48, %v789_v47 }
 0x137   : > { %v1009_v52 = vpack.c.bf16 %v788_v50, %v787_v49 }
 0x138   : > { %1018 = vst [vmem:[%s388_s4 + $0x18] sm:$0xff] %v1014_v51  }
 0x139   : > { %1017 = vst [vmem:[%s388_s4 + $0x10] sm:$0xff] %v1009_v52  }
 0x13a PF: > { %s13_s16 = sadd.s32 1, %s1209_s16   ;;  %s1363_s12 = smov %s1197_s13 }
 0x13b   : > { %p10_p10 = scmp.ge.s32.totalorder %s13_s16, 4   ;;  %s1364_s13 = smov %s1266_s20 }
 0x13c   : > { %s1365_s14 = smov %s1205_s15  ;;  %s1366_s15 = smov %s1368_s17 }
 0x13d   :  { %12 = sbr.rel (!%p10_p10) target bundleno = 3 (0x3), region = 114 }

// kernel: convnet_forward.4
= control target key start
LH: loop header
LB: loop body
LE: loop exit
PB: predicated region body
PF: predicated region fallthrough
CT: control target
= control target key end

     0   :  { %s1021_s1 = inlined_call_operand.vmem [shape: bf16[384,128], index: 1, kind: input, shape index: {}]   ;;  %s1022_s0 = inlined_call_operand.vmem [shape: bf16[4,32,384], index: 0, kind: input, shape index: {}]   ;;  %s1023_s2 = inlined_call_operand.vmem [shape: f32[1,128], index: 2, kind: input, shape index: {}]   ;;  %s1024_s3 = inlined_call_operand.vmem [shape: bf16[32,128], index: 3, kind: output, shape index: {}]  }
   0x1   :  { %v792_v0 = vld [vmem:[%s1021_s1 + $0x40] sm:$0xff]   ;;  %v795_v3 = vld [vmem:[%s1021_s1 + $0x48] sm:$0xff]   ;;  %v798_v6 = vld [vmem:[%s1021_s1 + $0x50] sm:$0xff]  }
   0x2   :  { %v793_v1 = vld [vmem:[%s1021_s1] sm:$0xff]   ;;  %680 = vmatprep.subr.bf16.mxu0 %v792_v0  ;;  %v796_v4 = vld [vmem:[%s1021_s1 + $0x8] sm:$0xff]   ;;  %v799_v7 = vld [vmem:[%s1021_s1 + $0x10] sm:$0xff]  }
   0x3   :  { %v794_v2 = vld [vmem:[%s1021_s1 + $0x80] sm:$0xff]   ;;  %681 = vmatpush3.bf16.msra.mxu0 %v793_v1  ;;  %v797_v5 = vld [vmem:[%s1021_s1 + $0x88] sm:$0xff]   ;;  %v800_v8 = vld [vmem:[%s1021_s1 + $0x90] sm:$0xff]  }
   0x4   :  { %760 = vmatprep.subr.bf16.mxu1 %v794_v2  ;;  %682 = vmatprep.subr.bf16.mxu0 %v795_v3  ;;  %v801_v9 = vld [vmem:[%s1021_s1 + $0x58] sm:$0xff]   ;;  %v804_v12 = vld [vmem:[%s1021_s1 + $0x60] sm:$0xff]   ;;  %v807_v15 = vld [vmem:[%s1021_s1 + $0x68] sm:$0xff]  }
   0x5   :  { %761 = vmatpush3.bf16.msra.mxu1 %v794_v2  ;;  %v802_v10 = vld [vmem:[%s1021_s1 + $0x18] sm:$0xff]   ;;  %v806_v13 = vld [vmem:[%s1021_s1 + $0xa0] sm:$0xff]   ;;  %v809_v16 = vld [vmem:[%s1021_s1 + $0xa8] sm:$0xff]  }
   0x6   :  { %762 = vmatprep.subr.bf16.mxu1 %v797_v5  ;;  %v803_v11 = vld [vmem:[%s1021_s1 + $0x98] sm:$0xff]   ;;  %v805_v14 = vld [vmem:[%s1021_s1 + $0x20] sm:$0xff]   ;;  %v808_v17 = vld [vmem:[%s1021_s1 + $0x28] sm:$0xff]  }
   0x7   :  { %683 = vmatpush3.bf16.msra.mxu0 %v796_v4  ;;  %v810_v18 = vld [vmem:[%s1021_s1 + $0x70] sm:$0xff]   ;;  %v813_v21 = vld [vmem:[%s1021_s1 + $0x78] sm:$0xff]   ;;  %v816_v26 = vld [vmem:[%s1022_s0] ss:$12 sps:$4 sm:$0xff]  }
   0x8   :  { %684 = vmatprep.subr.bf16.mxu0 %v798_v6  ;;  %v811_v19 = vld [vmem:[%s1021_s1 + $0x30] sm:$0xff]   ;;  %v815_v22 = vld [vmem:[%s1021_s1 + $0xb8] sm:$0xff]   ;;  %v820_v28 = vld [vmem:[%s1022_s0 + $0x20] ss:$12 sps:$4 sm:$0xff]  }
   0x9   :  { %763 = vmatpush3.bf16.msra.mxu1 %v797_v5  ;;  %v812_v20 = vld [vmem:[%s1021_s1 + $0xb0] sm:$0xff]   ;;  %v814_v25 = vld [vmem:[%s1021_s1 + $0x38] sm:$0xff]   ;;  %v836_v36 = vld [vmem:[%s1022_s0 + $0x80] ss:$12 sps:$4 sm:$0xff]  }
   0xa   :  { %764 = vmatprep.subr.bf16.mxu1 %v800_v8  ;;  %v818_v23 = vld [vmem:[%s1022_s0 + $0x4] ss:$12 sps:$4 sm:$0xff]   ;;  %v819_v24 = vld [vmem:[%s1022_s0 + $0x8] ss:$12 sps:$4 sm:$0xff]   ;;  %v829_v35 = vld [vmem:[%s1022_s0 + $0x4c] ss:$12 sps:$4 sm:$0xff]  }
   0xb   :  { %685 = vmatpush3.bf16.msra.mxu0 %v799_v7  ;;  %399 = vmatprep.mubr.bf16.mxu0 %v818_v23  ;;  %v821_v27 = vld [vmem:[%s1022_s0 + $0x1c] ss:$12 sps:$4 sm:$0xff]   ;;  %v827_v29 = vld [vmem:[%s1022_s0 + $0x38] ss:$12 sps:$4 sm:$0xff]   ;;  %v824_v31 = vld [vmem:[%s1022_s0 + $0x34] ss:$12 sps:$4 sm:$0xff]  }
   0xc   :  { %686 = vmatprep.subr.bf16.mxu0 %v801_v9  ;;  %776 = vmatprep.mubr.bf16.mxu1 %v819_v24  ;;  %v823_v30 = vld [vmem:[%s1022_s0 + $0x18] ss:$12 sps:$4 sm:$0xff]   ;;  %v828_v32 = vld [vmem:[%s1022_s0 + $0x50] ss:$12 sps:$4 sm:$0xff]   ;;  %v835_v33 = vld [vmem:[%s1022_s0 + $0x68] ss:$12 sps:$4 sm:$0xff]  }
   0xd   :  { %765 = vmatpush3.bf16.msra.mxu1 %v800_v8  ;;  %v826_v34 = vld [vmem:[%s1022_s0 + $0x30] ss:$12 sps:$4 sm:$0xff]   ;;  %v843_v37 = vld [vmem:[%s1022_s0 + $0x98] ss:$12 sps:$4 sm:$0xff]   ;;  %v831_v38 = vld [vmem:[%s1022_s0 + $0x48] ss:$12 sps:$4 sm:$0xff]  }
   0xe   :  { %766 = vmatprep.subr.bf16.mxu1 %v803_v11  ;;  %v832_v39 = vld [vmem:[%s1022_s0 + $0x64] ss:$12 sps:$4 sm:$0xff]   ;;  %v834_v41 = vld [vmem:[%s1022_s0 + $0x60] ss:$12 sps:$4 sm:$0xff]   ;;  %v837_v42 = vld [vmem:[%s1022_s0 + $0x7c] ss:$12 sps:$4 sm:$0xff]  }
   0xf   :  { %687 = vmatpush3.bf16.msra.mxu0 %v802_v10  ;;  %v844_v40 = vld [vmem:[%s1022_s0 + $0xb0] ss:$12 sps:$4 sm:$0xff]   ;;  %v839_v43 = vld [vmem:[%s1022_s0 + $0x78] ss:$12 sps:$4 sm:$0xff]   ;;  %v840_v44 = vld [vmem:[%s1022_s0 + $0x94] ss:$12 sps:$4 sm:$0xff]  }
  0x10   :  { %688 = vmatprep.subr.bf16.mxu0 %v804_v12  ;;  %v842_v45 = vld [vmem:[%s1022_s0 + $0x90] ss:$12 sps:$4 sm:$0xff]   ;;  %v845_v46 = vld [vmem:[%s1022_s0 + $0xac] ss:$12 sps:$4 sm:$0xff]   ;;  %v847_v47 = vld [vmem:[%s1022_s0 + $0xa8] ss:$12 sps:$4 sm:$0xff]  }
  0x11   :  { %767 = vmatpush3.bf16.msra.mxu1 %v803_v11 }
  0x12   :  { %768 = vmatprep.subr.bf16.mxu1 %v806_v13 }
  0x13   :  { %689 = vmatpush3.bf16.msra.mxu0 %v805_v14 }
  0x14   :  { %690 = vmatprep.subr.bf16.mxu0 %v807_v15 }
  0x15   :  { %769 = vmatpush3.bf16.msra.mxu1 %v806_v13 }
  0x16   :  { %770 = vmatprep.subr.bf16.mxu1 %v809_v16 }
  0x17   :  { %691 = vmatpush3.bf16.msra.mxu0 %v808_v17 }
  0x18   :  { %692 = vmatprep.subr.bf16.mxu0 %v810_v18 }
  0x19   :  { %771 = vmatpush3.bf16.msra.mxu1 %v809_v16 }
  0x1a   :  { %772 = vmatprep.subr.bf16.mxu1 %v812_v20 }
  0x1b   :  { %693 = vmatpush3.bf16.msra.mxu0 %v811_v19 }
  0x1c   :  { %694 = vmatprep.subr.bf16.mxu0 %v813_v21 }
  0x1d   :  { %773 = vmatpush3.bf16.msra.mxu1 %v812_v20 }
  0x1e   :  { %774 = vmatprep.subr.bf16.mxu1 %v815_v22 }
  0x1f   :  { %695 = vmatpush3.bf16.msra.mxu0 %v814_v25 }
  0x21   :  { %775 = vmatpush3.bf16.msra.mxu1 %v815_v22 }
  0x22   :  { %400 = vmatmul.mubr.bf16.vlgmr.msra.gmra.mrb[0].mxu0 %v816_v26 }
  0x23   :  { %407 = vmatprep.mubr.bf16.mxu0 %v821_v27 }
  0x24   :  { %777 = vmatmul.mubr.bf16.vlgmr.msra.gmra.mrb[0].mxu1 %v820_v28 }
  0x25   :  { %780 = vmatprep.mubr.bf16.mxu1 %v827_v29 }
  0x2a   :  { %408 = vmatmul.mubr.bf16.gmra.mrb[4].mxu0 %v823_v30 }
  0x2b   :  { %415 = vmatprep.mubr.bf16.mxu0 %v824_v31 }
  0x2c   :  { %781 = vmatmul.mubr.bf16.gmra.mrb[4].mxu1 %v828_v32 }
  0x2d   :  { %784 = vmatprep.mubr.bf16.mxu1 %v835_v33 }
  0x32   :  { %416 = vmatmul.mubr.bf16.gmra.mrb[8].mxu0 %v826_v34 }
  0x33   :  { %423 = vmatprep.mubr.bf16.mxu0 %v829_v35 }
  0x34   :  { %785 = vmatmul.mubr.bf16.gmra.mrb[8].mxu1 %v836_v36 }
  0x35   :  { %788 = vmatprep.mubr.bf16.mxu1 %v843_v37 }
  0x3a   :  { %424 = vmatmul.mubr.bf16.gmra.mrb[12].mxu0 %v831_v38 }
  0x3b   :  { %431 = vmatprep.mubr.bf16.mxu0 %v832_v39 }
  0x3c   :  { %789 = vmatmul.mubr.bf16.gmra.mrb[12].mxu1 %v844_v40 }
  0x42   :  { %432 = vmatmul.mubr.bf16.gmra.mrb[16].mxu0 %v834_v41 }
  0x43   :  { %439 = vmatprep.mubr.bf16.mxu0 %v837_v42 }
  0x4a   :  { %440 = vmatmul.mubr.bf16.gmra.mrb[20].mxu0 %v839_v43 }
  0x4b   :  { %447 = vmatprep.mubr.bf16.mxu0 %v840_v44 }
  0x52   :  { %448 = vmatmul.mubr.bf16.gmra.mrb[24].mxu0 %v842_v45 }
  0x53   :  { %455 = vmatprep.mubr.bf16.mxu0 %v845_v46 }
  0x5a   :  { %456 = vmatmul.mubr.bf16.gmra.mrb[28].mxu0 %v847_v47 }
  0xf5   :  { %v696_v48 = vpop.f32.mrb[0].mxu0 }
  0xf6   :  { %v697_v49 = vpop.f32.mrb[1].mxu0 }
  0xf7   :  { %v698_v50 = vadd.f32 %v697_v49, %v696_v48  ;;  %v699_v51 = vpop.f32.mrb[2].mxu0  ;;  %v778_v52 = vpop.f32.mrb[0].mxu1 }
  0xf8   :  { %v700_v53 = vpop.f32.mrb[3].mxu0  ;;  %v498_v54 = vpop.f32.mrb[1].mxu1 }
  0xf9   :  { %v701_v55 = vadd.f32 %v700_v53, %v699_v51  ;;  %v499_v56 = vadd.f32 %v698_v50, %v498_v54  ;;  %v779_v57 = vpop.f32.mrb[2].mxu1 }
  0xfa   :  { %v501_v58 = vpop.f32.mrb[3].mxu1 }
  0xfb   :  { %v502_v59 = vadd.f32 %v701_v55, %v501_v58 }
  0xfd   :  { %v702_v60 = vpop.f32.mrb[4].mxu0 }
  0xfe   :  { %v703_v61 = vpop.f32.mrb[5].mxu0 }
  0xff   :  { %v704_v62 = vadd.f32 %v703_v61, %v702_v60  ;;  %v705_v63 = vpop.f32.mrb[6].mxu0  ;;  %v782_v0 = vpop.f32.mrb[4].mxu1 }
 0x100   :  { %v706_v1 = vpop.f32.mrb[7].mxu0  ;;  %v514_v2 = vpop.f32.mrb[5].mxu1 }
 0x101   :  { %v507_v3 = vadd.f32 %v778_v52, %v704_v62  ;;  %v707_v4 = vadd.f32 %v706_v1, %v705_v63  ;;  %v783_v5 = vpop.f32.mrb[6].mxu1  ;;  %v660_v63 = vld [vmem:[%s1023_s2] ss:$0 sm:$0xff] }
 0x102   :  { %v517_v6 = vpop.f32.mrb[7].mxu1 }
 0x103   :  { %v510_v7 = vadd.f32 %v779_v57, %v707_v4 }
 0x105   :  { %v708_v8 = vpop.f32.mrb[8].mxu0 }
 0x106   :  { %v709_v9 = vpop.f32.mrb[9].mxu0 }
 0x107   :  { %v710_v10 = vadd.f32 %v709_v9, %v708_v8  ;;  %v711_v11 = vpop.f32.mrb[10].mxu0  ;;  %v786_v12 = vpop.f32.mrb[8].mxu1 }
 0x108   :  { %v712_v13 = vpop.f32.mrb[11].mxu0  ;;  %v530_v14 = vpop.f32.mrb[9].mxu1 }
 0x109   :  { %v713_v15 = vadd.f32 %v712_v13, %v711_v11  ;;  %v515_v16 = vadd.f32 %v710_v10, %v514_v2  ;;  %v787_v17 = vpop.f32.mrb[10].mxu1 }
 0x10a   :  { %v533_v18 = vpop.f32.mrb[11].mxu1 }
 0x10b   :  { %v561_v19 = vmax.f32 %v499_v56, %v515_v16  ;;  %v518_v20 = vadd.f32 %v713_v15, %v517_v6 }
 0x10d   :  { %v564_v21 = vmax.f32 %v502_v59, %v518_v20  ;;  %v714_v22 = vpop.f32.mrb[12].mxu0 }
 0x10e   :  { %v715_v23 = vpop.f32.mrb[13].mxu0 }
 0x10f   :  { %v716_v24 = vadd.f32 %v715_v23, %v714_v22  ;;  %v717_v25 = vpop.f32.mrb[14].mxu0  ;;  %v790_v26 = vpop.f32.mrb[12].mxu1 }
 0x110   :  { %v718_v27 = vpop.f32.mrb[15].mxu0  ;;  %v546_v28 = vpop.f32.mrb[13].mxu1 }
 0x111   :  { %v523_v29 = vadd.f32 %v782_v0, %v716_v24  ;;  %v719_v30 = vadd.f32 %v718_v27, %v717_v25  ;;  %v791_v31 = vpop.f32.mrb[14].mxu1 }
 0x112   :  { %v549_v32 = vpop.f32.mrb[15].mxu1 }
 0x113   :  { %v567_v33 = vmax.f32 %v507_v3, %v523_v29  ;;  %v526_v34 = vadd.f32 %v783_v5, %v719_v30 }
 0x115   :  { %v570_v35 = vmax.f32 %v510_v7, %v526_v34  ;;  %v720_v36 = vpop.f32.mrb[16].mxu0 }
 0x116   :  { %v721_v37 = vpop.f32.mrb[17].mxu0 }
 0x117   :  { %v722_v38 = vadd.f32 %v721_v37, %v720_v36  ;;  %v723_v39 = vpop.f32.mrb[18].mxu0 }
 0x118   :  { %v724_v40 = vpop.f32.mrb[19].mxu0 }
 0x119   :  { %v725_v41 = vadd.f32 %v724_v40, %v723_v39  ;;  %v531_v42 = vadd.f32 %v722_v38, %v530_v14 }
 0x11b   :  { %v562_v43 = vmax.f32 %v561_v19, %v531_v42  ;;  %v534_v44 = vadd.f32 %v725_v41, %v533_v18 }
 0x11d   :  { %v565_v45 = vmax.f32 %v564_v21, %v534_v44  ;;  %v726_v46 = vpop.f32.mrb[20].mxu0 }
 0x11e   :  { %v727_v47 = vpop.f32.mrb[21].mxu0 }
 0x11f   :  { %v728_v48 = vadd.f32 %v727_v47, %v726_v46  ;;  %v729_v49 = vpop.f32.mrb[22].mxu0 }
 0x120   :  { %v730_v50 = vpop.f32.mrb[23].mxu0 }
 0x121   :  { %v539_v51 = vadd.f32 %v786_v12, %v728_v48  ;;  %v731_v52 = vadd.f32 %v730_v50, %v729_v49 }
 0x123   :  { %v568_v53 = vmax.f32 %v567_v33, %v539_v51  ;;  %v542_v54 = vadd.f32 %v787_v17, %v731_v52 }
 0x125   :  { %v571_v55 = vmax.f32 %v570_v35, %v542_v54  ;;  %v732_v56 = vpop.f32.mrb[24].mxu0 }
 0x126   :  { %v733_v57 = vpop.f32.mrb[25].mxu0 }
 0x127   :  { %v734_v58 = vadd.f32 %v733_v57, %v732_v56  ;;  %v735_v59 = vpop.f32.mrb[26].mxu0 }
 0x128   :  { %v736_v60 = vpop.f32.mrb[27].mxu0 }
 0x129   :  { %v737_v61 = vadd.f32 %v736_v60, %v735_v59  ;;  %v547_v62 = vadd.f32 %v734_v58, %v546_v28 }
 0x12b   :  { %v563_v0 = vmax.f32 %v562_v43, %v547_v62  ;;  %v550_v1 = vadd.f32 %v737_v61, %v549_v32 }
 0x12d   :  { %v580_v2 = vadd.f32 %v660_v63, %v563_v0  ;;  %v566_v3 = vmax.f32 %v565_v45, %v550_v1  ;;  %v738_v4 = vpop.f32.mrb[28].mxu0 }
 0x12e   :  { %v739_v5 = vpop.f32.mrb[29].mxu0 }
 0x12f   :  { %v581_v6 = vadd.f32 %v660_v63, %v566_v3  ;;  %v740_v7 = vadd.f32 %v739_v5, %v738_v4  ;;  %v741_v8 = vpop.f32.mrb[30].mxu0  ;;  %v584_v10 = vmax.f32 %v580_v2, 0.0 }
 0x130   :  { %v742_v9 = vpop.f32.mrb[31].mxu0 }
 0x131   :  { %v585_v11 = vmax.f32 %v581_v6, 0.0  ;;  %v555_v12 = vadd.f32 %v790_v26, %v740_v7  ;;  %v743_v13 = vadd.f32 %v742_v9, %v741_v8 }
 0x133   :  { %v672_v14 = vpack.c.bf16 %v585_v11, %v584_v10  ;;  %v569_v15 = vmax.f32 %v568_v53, %v555_v12  ;;  %v558_v16 = vadd.f32 %v791_v31, %v743_v13 }
 0x135   :  { %673 = vst [vmem:[%s1024_s3] sm:$0xff] %v672_v14   ;;  %v582_v17 = vadd.f32 %v660_v63, %v569_v15  ;;  %v572_v18 = vmax.f32 %v571_v55, %v558_v16 }
 0x137   :  { %v583_v19 = vadd.f32 %v660_v63, %v572_v18  ;;  %v586_v20 = vmax.f32 %v582_v17, 0.0 }
 0x139   :  { %v587_v21 = vmax.f32 %v583_v19, 0.0 }
 0x13b   :  { %v677_v22 = vpack.c.bf16 %v587_v21, %v586_v20 }
 0x13d   :  { %679 = vst [vmem:[%s1024_s3 + $0x8] sm:$0xff] %v677_v22  }

// kernel: convnet_forward.5
= control target key start
LH: loop header
LB: loop body
LE: loop exit
PB: predicated region body
PF: predicated region fallthrough
CT: control target
= control target key end

     0   :  { %vm81_vm0 = vcmask 523264   ;;  %s653_s0 = inlined_call_operand.vmem [shape: bf16[32,64], index: 0, kind: input, shape index: {}]   ;;  %s654_s1 = inlined_call_operand.vmem [shape: bf16[64,64], index: 1, kind: input, shape index: {}]   ;;  %s655_s2 = inlined_call_operand.vmem [shape: f32[1,64], index: 2, kind: input, shape index: {}]   ;;  %s656_s3 = inlined_call_operand.vmem [shape: bf16[64,128], index: 3, kind: input, shape index: {}]   ;;  %s657_s4 = inlined_call_operand.vmem [shape: f32[1,128], index: 4, kind: input, shape index: {}]   ;;  %s658_s5 = inlined_call_operand.vmem [shape: bf16[128,128], index: 5, kind: input, shape index: {}]   ;;  %s659_s6 = inlined_call_operand.vmem [shape: f32[1,128], index: 6, kind: input, shape index: {}]   ;;  %s660_s7 = inlined_call_operand.hbm [shape: f32[2,128], index: 7, kind: output, shape index: {}]  }
   0x1   :  { %v472_v0 = vld [vmem:[%s654_s1] sm:$0xff]   ;;  %v473_v1 = vld [vmem:[%s654_s1 + $0x8] sm:$0xff]   ;;  %v474_v2 = vld [vmem:[%s654_s1 + $0x10] sm:$0xff]  }
   0x2   :  { %425 = vmatprep.subr.bf16.mxu1 %v472_v0  ;;  %v476_v3 = vld [vmem:[%s653_s0] sm:$0xff]   ;;  %v475_v4 = vld [vmem:[%s654_s1 + $0x18] sm:$0xff]   ;;  %v477_v5 = vld [vmem:[%s653_s0 + $0x8] sm:$0xff]  }
   0x3   :  { %426 = vmatpush3.bf16.msra.mxu1 %v472_v0  ;;  %433 = vmatprep.mubr.msk.bf16.mxu1 %vm81_vm0, %v476_v3 }
   0x4   :  { %427 = vmatprep.subr.bf16.mxu1 %v473_v1 }
   0x7   :  { %428 = vmatpush3.bf16.msra.mxu1 %v473_v1 }
   0x8   :  { %429 = vmatprep.subr.bf16.mxu1 %v474_v2 }
   0xb   :  { %430 = vmatpush3.bf16.msra.mxu1 %v474_v2 }
   0xc   :  { %431 = vmatprep.subr.bf16.mxu1 %v475_v4 }
   0xd   :  { %12 = vsyncpa [#allocation3], 0  ;;  %v478_v6 = vld [vmem:[%s656_s3] sm:$0xff]   ;;  %v514_v7 = vmov 0.0   ;;  %v479_v8 = vld [vmem:[%s656_s3 + $0x8] sm:$0xff]   ;;  %vm515_vm1 = vmmov 0  }
   0xe   :  { %449 = vmatprep.subr.bf16.mxu0 %v514_v7  ;;  %v480_v9 = vld [vmem:[%s656_s3 + $0x10] sm:$0xff]   ;;  %v481_v10 = vld [vmem:[%s656_s3 + $0x18] sm:$0xff]   ;;  %465 = vmatprep.mubr.msk.bf16.mxu0 %vm515_vm1, %v514_v7  ;;  %v482_v11 = vld [vmem:[%s658_s5] sm:$0xff]   ;;  %vm183_vm2 = vcmask 1041409   ;;  %s516_s15 = smov [#allocation2]  }
   0xf   :  { %432 = vmatpush3.bf16.msra.mxu1 %v475_v4  ;;  %450 = vmatpush3.bf16.msra.mxu0 %v482_v11  ;;  %v483_v12 = vld [vmem:[%s658_s5 + $0x8] sm:$0xff]   ;;  %v484_v13 = vld [vmem:[%s658_s5 + $0x10] sm:$0xff]   ;;  %v485_v14 = vld [vmem:[%s658_s5 + $0x18] sm:$0xff]   ;;  %s373_s0 = sshll.u32 %s516_s15, 4  ;;  %s374_s0 = int_to_ptr.vmem [resolvable:$true] %s373_s0 }
  0x10   :  { %437 = vmatprep.subr.bf16.mxu1 %v514_v7  ;;  %451 = vmatprep.subr.bf16.mxu0 %v514_v7  ;;  %v486_v15 = vld [vmem:[%s658_s5 + $0x20] sm:$0xff]   ;;  %v487_v16 = vld [vmem:[%s658_s5 + $0x28] sm:$0xff]   ;;  %v488_v56 = vld [vmem:[%s658_s5 + $0x30] sm:$0xff]   ;;  %p495_p1 = scmp.lt.s32.totalorder %s374_s0, %s374_s0 }
  0x11   :  { %v381_v17 = vld [vmem:[%s655_s2] ss:$0 sm:$0xff]  ;;  %v489_v57 = vld [vmem:[%s658_s5 + $0x38] sm:$0xff]  }
  0x12   :  { %434 = vmatmul.mubr.msk.bf16.vlgmr.msra.gmra.mrb[0].mxu1 %vm81_vm0, %v477_v5  ;;  %v390_v58 = vld [vmem:[%s657_s4] ss:$0 sm:$0xff]  ;;  %s490_s4 = scalar_lea.vmem %s374_s0, 32 }
  0x13   :  { %438 = vmatpush3.bf16.msra.mxu1 %v478_v6  ;;  %445 = vmatprep.mubr.msk.bf16.mxu1 %vm515_vm1, %v514_v7  ;;  %v396_v2 = vld [vmem:[%s659_s6] ss:$0 sm:$0xff]  ;;  %p491_p0 = scmp.ne.s32.totalorder %s374_s0, %s490_s4  ;;  %p496_p2 = scmp.lt.s32.totalorder %s490_s4, %s490_s4 }
  0x14   :  { %439 = vmatprep.subr.bf16.mxu1 %v514_v7  ;;  %452 = vmatpush3.bf16.msra.mxu0 %v483_v12 }
  0x15   :  { %453 = vmatprep.subr.bf16.mxu0 %v514_v7  ;;  %p497_p3 = por %p496_p2, %p495_p1 }
  0x17   :  { %440 = vmatpush3.bf16.msra.mxu1 %v479_v8  ;;  %p498_p4 = pnand %p497_p3, %p491_p0 }
  0x18   :  { %441 = vmatprep.subr.bf16.mxu1 %v514_v7  ;;  %454 = vmatpush3.bf16.msra.mxu0 %v484_v13 }
  0x19   :  { %455 = vmatprep.subr.bf16.mxu0 %v514_v7 }
  0x1b   :  { %442 = vmatpush3.bf16.msra.mxu1 %v480_v9 }
  0x1c   :  { %443 = vmatprep.subr.bf16.mxu1 %v514_v7  ;;  %456 = vmatpush3.bf16.msra.mxu0 %v485_v14 }
  0x1d   :  { %457 = vmatprep.subr.bf16.mxu0 %v514_v7 }
  0x1f   :  { %444 = vmatpush3.bf16.msra.mxu1 %v481_v10 }
  0x20   :  { %458 = vmatpush3.bf16.msra.mxu0 %v486_v15 }
  0x21   :  { %459 = vmatprep.subr.bf16.mxu0 %v514_v7 }
  0x24   :  { %460 = vmatpush3.bf16.msra.mxu0 %v487_v16 }
  0x25   :  { %461 = vmatprep.subr.bf16.mxu0 %v514_v7 }
  0x28   :  { %462 = vmatpush3.bf16.msra.mxu0 %v488_v56 }
  0x29   :  { %463 = vmatprep.subr.bf16.mxu0 %v514_v7 }
  0x2c   :  { %464 = vmatpush3.bf16.msra.mxu0 %v489_v57 }
  0xe5   :  { %v435_v18 = vpop.f32.mrb[0].mxu1 }
  0xe6   :  { %v131_v19 = vadd.f32 %v435_v18, %v381_v17  ;;  %v122_v20 = vpop.f32.mrb[1].mxu1 }
  0xe7   :  { %v123_v21 = vadd.f32 %v381_v17, %v122_v20  ;;  %v436_v22 = vpop.f32.mrb[2].mxu1 }
  0xe8   :  { %v139_v23 = vmax.f32 %v131_v19, 0.0  ;;  %v134_v24 = vadd.f32 %v436_v22, %v381_v17  ;;  %v125_v25 = vpop.f32.mrb[3].mxu1 }
  0xe9   :  { %v137_v26 = vmax.f32 %v123_v21, 0.0  ;;  %v126_v27 = vadd.f32 %v381_v17, %v125_v25 }
  0xea   :  { %v140_v28 = vmax.f32 %v134_v24, 0.0  ;;  %v150_v30 = vsel %vm81_vm0, %v139_v23, 0.0 }
  0xeb   :  { %v138_v29 = vmax.f32 %v126_v27, 0.0  ;;  %v141_v32 = vsel %vm81_vm0, %v137_v26, 0.0 }
  0xec   :  { %v151_v31 = vsel %vm81_vm0, %v140_v28, 0.0 }
  0xed   :  { %v152_v33 = vadd.f32 %v151_v31, %v150_v30  ;;  %v142_v34 = vsel %vm81_vm0, %v138_v29, 0.0 }
  0xee   :  { %v143_v35 = vadd.f32 %v142_v34, %v141_v32 }
  0xef   :  { %v153_v36 = vrot.slane %v152_v33, 4 }
  0xf0   :  { %v144_v37 = vrot.slane %v143_v35, 4 }
  0xf1   :  { %v154_v38 = vadd.f32 %v153_v36, %v152_v33 }
  0xf2   :  { %v145_v39 = vadd.f32 %v144_v37, %v143_v35 }
  0xf3   :  { %v155_v40 = vrot.slane %v154_v38, 2 }
  0xf4   :  { %v146_v41 = vrot.slane %v145_v39, 2 }
  0xf5   :  { %v156_v42 = vadd.f32 %v155_v40, %v154_v38 }
  0xf6   :  { %v147_v43 = vadd.f32 %v146_v41, %v145_v39 }
  0xf7   :  { %v157_v44 = vrot.slane %v156_v42, 1 }
  0xf8   :  { %v148_v45 = vrot.slane %v147_v43, 1 }
  0xf9   :  { %v158_v46 = vadd.f32 %v157_v44, %v156_v42 }
  0xfa   :  { %v149_v47 = vadd.f32 %v148_v45, %v147_v43 }
  0xfb   :  { %v161_v48 = vmul.f32 0.0625, %v158_v46 }
  0xfc   :  { %v160_v49 = vmul.f32 0.0625, %v149_v47 }
  0xfd   :  { %v163_v50 = vpack.c.bf16 %v161_v48, %v161_v48 }
  0xfe   :  { %v162_v51 = vpack.c.bf16 %v160_v49, %v160_v49 }
  0xff   :  { %v182_v52 = vunpack.c.l.b16 %v163_v50 }
 0x100   :  { %v181_v53 = vunpack.c.l.b16 %v162_v51 }
 0x102   :  { %v184_v54 = vsel %vm183_vm2, %v182_v52, %v181_v53 }
 0x103   :  { %v185_v55 = vpack.c.b16 %v184_v54, %v184_v54 }
 0x105   :  { %446 = vmatmul.mubr.msk.bf16.vlgmr.msra.gmra.mrb[4].mxu1 %vm81_vm0, %v185_v55 }
 0x1d8   :  { %v247_v59 = vpop.f32.mrb[4].mxu1 }
 0x1d9   :  { %v248_v60 = vadd.f32 %v390_v58, %v247_v59  ;;  %v447_v61 = vpop.f32.mrb[5].mxu1 }
 0x1da   :  { %v250_v62 = vpop.f32.mrb[6].mxu1 }
 0x1db   :  { %v253_v63 = vmax.f32 %v248_v60, 0.0  ;;  %v448_v0 = vpop.f32.mrb[7].mxu1 }
 0x1dd   :  { %v254_v1 = vpack.c.bf16 %v253_v63, %v253_v63 }
 0x1df   :  { %466 = vmatmul.mubr.bf16.vlgmr.msra.gmra.mrb[0].mxu0 %v254_v1 }
 0x2b2   :  { %v360_v3 = vpop.f32.mrb[0].mxu0 }
 0x2b3   :  { %v361_v4 = vadd.f32 %v396_v2, %v360_v3  ;;  %v467_v5 = vpop.f32.mrb[1].mxu0 }
 0x2b4   :  { %v363_v6 = vpop.f32.mrb[2].mxu0 }
 0x2b5   :  { %366 = vst [vmem:[#allocation2] sm:$0x3] %v361_v4  ;;  %v468_v7 = vpop.f32.mrb[3].mxu0 }
 0x2b6   :  { %501 = shalt.err (!%p498_p4)
}
 0x2b7   :  { %s502_s6 = scalar_lea.hbm %s660_s7, 32 }
 0x2b8   :  { %p503_p5 = scmp.ne.s32.totalorder %s660_s7, %s502_s6  ;;  %p506_p6 = scmp.lt.u32.totalorder %s502_s6, %s660_s7 }
 0x2ba   :  { %p508_p7 = pnand %p506_p6, %p503_p5 }
 0x2bc   :  { %511 = shalt.err (!%p508_p7)
}
 0x2bd   :  { %376 = dma.vmem_to_hbm [thread:$0]  %s374_s0, 32, %s660_s7, [#allocation3]  }
 0x2be   :  { %512 = dma.done.wait [#allocation3], 32  }
 0x2bf   :  { %513 = vsyncadd [#allocation3], 4294967264 }
 0x2c0   :  { %380 = vsyncpa [#allocation3], 1 }

</bundles_post_ra>
